<compile_context>
chip_gen: v5e
topology: v5e:2x2
jax: 0.10.0
libtpu: 0.0.40
codegen_flags: <defaults>
</compile_context>

<pallas_src>
import math

import jax
import jax.numpy as jnp
from jax import lax
from jax.experimental import pallas as pl
from jax.experimental.pallas import tpu as pltpu

IN_DIM = 64
HID_DIM = 32
OUT_DIM = 64
PACK = 2  # samples packed per 128-lane row


def _round_up(n, m):
    return ((n + m - 1) // m) * m


def _block_diag2(w):
    """[[w, 0], [0, w]] for 2-D w."""
    z = jnp.zeros_like(w)
    top = jnp.concatenate([w, z], axis=1)
    bot = jnp.concatenate([z, w], axis=1)
    return jnp.concatenate([top, bot], axis=0)


def bp_kernel(x_ref, w1_ref, b1_ref, w2_ref, b2_ref, o_ref):
    # x_ref: [TR, 128] -- two 64-feature samples packed per 128-lane row.
    x = x_ref[...]

    # layer1 + ReLU (block-diagonal weights keep the packed pair independent)
    h = jnp.dot(x, w1_ref[...], preferred_element_type=jnp.float32) + b1_ref[...]
    h = jnp.maximum(h, 0.0)                                    # [TR, 2*32] f32

    # layer2 + ReLU (cast back to the matmul dtype for the MXU; no-op for f32)
    h = h.astype(w2_ref.dtype)
    y = jnp.dot(h, w2_ref[...], preferred_element_type=jnp.float32) + b2_ref[...]
    y = jnp.maximum(y, 0.0)                                    # [TR, 2*64] f32

    # Per-sample softmax over 64 features: lanes [0,64) and [64,128) are two
    # independent samples -> segmented reductions via a lane mask (no reshape,
    # all ops are VPU elementwise + full-row XLU reductions + EUP exp/recip).
    lane = lax.broadcasted_iota(jnp.int32, y.shape, dimension=1)
    lo = lane < OUT_DIM
    # y >= 0 after ReLU, so 0.0 is a safe fill value for the segmented max.
    m_lo = jnp.max(jnp.where(lo, y, 0.0), axis=-1, keepdims=True)
    m_hi = jnp.max(jnp.where(lo, 0.0, y), axis=-1, keepdims=True)
    m = jnp.where(lo, m_lo, m_hi)                              # per-lane max
    e = jnp.exp(y - m)                                         # EUP
    s_lo = jnp.sum(jnp.where(lo, e, 0.0), axis=-1, keepdims=True)
    s_hi = jnp.sum(jnp.where(lo, 0.0, e), axis=-1, keepdims=True)
    s = jnp.where(lo, s_lo, s_hi)                              # per-lane denom
    # Approx reciprocal (EUP slot) + one Newton-Raphson refinement (VPU, free
    # under the memory roofline): row sums normalize to ~1e-6 instead of ~1e-3.
    r = pl.reciprocal(s, approx=True)
    r = r * (2.0 - s * r)
    o_ref[...] = (e * r).astype(o_ref.dtype)


def bp_net_forward(x, w1, b1, w2, b2, *, batch_tile=4096,
                   matmul_dtype=jnp.bfloat16, out_dtype=jnp.float32):
    """x: [B, 64]; weights stored [in, out]; biases [1, out]. Returns [B, 64].

    matmul_dtype: dtype of x / W on the MXU (None -> x.dtype).  bf16 halves the
        x read on v6e/v7x; for the full benefit the caller should already hold
        x (and reused weights) in that dtype, otherwise the wrapper casts once.
    out_dtype: output dtype (jnp.bfloat16 halves write traffic if downstream
        tolerates bf16 probabilities).
    batch_tile: max samples per grid step (rounded to the row granule).
    """
    assert x.ndim == 2 and x.shape[1] == IN_DIM
    B = x.shape[0]
    assert B >= 1

    mm_dtype = jnp.dtype(x.dtype if matmul_dtype is None else matmul_dtype)
    out_dtype = jnp.dtype(out_dtype)

    # Packed-row granule from the sublane tiling: (8,128) for f32, (16,128) bf16.
    row_granule = 8
    for dt in (mm_dtype, out_dtype):
        row_granule = max(row_granule, 8 * (4 // dt.itemsize))
    sample_granule = PACK * row_granule

    # Pad only to the granule (no full-tile pad); a no-op for typical batch sizes.
    B_pad = _round_up(B, sample_granule)
    if B_pad != B:
        x = jnp.pad(x, ((0, B_pad - B), (0, 0)))
    rows = B_pad // PACK                       # packed rows

    # Tile: as large as batch_tile allows, but keep >=4 grid steps when the
    # batch is big enough (v7x megacore sharding + >=2-deep software pipeline).
    tr_cap = _round_up(max(int(batch_tile), sample_granule), sample_granule) // PACK
    TR = min(tr_cap, _round_up(pl.cdiv(rows, 4), row_granule))
    grid = (pl.cdiv(rows, TR),)                # last block may be ragged

    # Lane-dense packing: two consecutive samples per 128-wide row (free reshape).
    x_packed = x.reshape(rows, PACK * IN_DIM).astype(mm_dtype)

    # Block-diagonal weights / duplicated biases (tiny; built once per call).
    w1_big = _block_diag2(w1).astype(mm_dtype)                       # (128, 64)
    w2_big = _block_diag2(w2).astype(mm_dtype)                       # (64, 128)
    b1_big = jnp.concatenate([b1, b1], axis=-1).astype(jnp.float32)  # (1, 64)
    b2_big = jnp.concatenate([b2, b2], axis=-1).astype(jnp.float32)  # (1, 128)

    cost = pl.CostEstimate(  # advisory; useful (non-block-diag) flops
        flops=int(2 * B_pad * (IN_DIM * HID_DIM + HID_DIM * OUT_DIM)),
        transcendentals=int(B_pad * OUT_DIM),
        bytes_accessed=int(
            x_packed.size * mm_dtype.itemsize
            + rows * PACK * OUT_DIM * out_dtype.itemsize
            + (w1_big.size + w2_big.size) * mm_dtype.itemsize
            + (b1_big.size + b2_big.size) * 4),
    )

    out_packed = pl.pallas_call(
        bp_kernel,
        out_shape=jax.ShapeDtypeStruct((rows, PACK * OUT_DIM), out_dtype),
        grid_spec=pltpu.PrefetchScalarGridSpec(
            num_scalar_prefetch=0,
            grid=grid,
            in_specs=[
                pl.BlockSpec((TR, PACK * IN_DIM), lambda i: (i, 0)),               # x tile
                pl.BlockSpec((PACK * IN_DIM, PACK * HID_DIM), lambda i: (0, 0)),   # W1 blockdiag
                pl.BlockSpec((1, PACK * HID_DIM), lambda i: (0, 0)),               # b1
                pl.BlockSpec((PACK * HID_DIM, PACK * OUT_DIM), lambda i: (0, 0)),  # W2 blockdiag
                pl.BlockSpec((1, PACK * OUT_DIM), lambda i: (0, 0)),               # b2
            ],
            out_specs=pl.BlockSpec((TR, PACK * OUT_DIM), lambda i: (i, 0)),
        ),
        compiler_params=pltpu.CompilerParams(
            dimension_semantics=("parallel",),
            vmem_limit_bytes=32 * 1024 * 1024,
        ),
        cost_estimate=cost,
    )(x_packed, w1_big, b1_big, w2_big, b2_big)

    out = out_packed.reshape(B_pad, OUT_DIM)   # contiguous reshape -> no copy
    return out if B_pad == B else out[:B]


def init_params(key):
    """Deterministic init mimicking PyTorch nn.Linear defaults
    (uniform(-1/sqrt(fan_in), 1/sqrt(fan_in))); weights stored as [in, out]."""
    k1, k2, k3, k4 = jax.random.split(key, 4)
    bound1 = 1.0 / math.sqrt(IN_DIM)
    bound2 = 1.0 / math.sqrt(HID_DIM)
    w1 = jax.random.uniform(k1, (IN_DIM, HID_DIM), jnp.float32, -bound1, bound1)
    b1 = jax.random.uniform(k2, (1, HID_DIM), jnp.float32, -bound1, bound1)
    w2 = jax.random.uniform(k3, (HID_DIM, OUT_DIM), jnp.float32, -bound2, bound2)
    b2 = jax.random.uniform(k4, (1, OUT_DIM), jnp.float32, -bound2, bound2)
    return w1, b1, w2, b2


def reference_forward(x, w1, b1, w2, b2):
    h = jnp.maximum(x @ w1 + b1, 0.0)
    y = jnp.maximum(h @ w2 + b2, 0.0)
    return jax.nn.softmax(y, axis=1)   # nn.Softmax() on 2-D input -> dim=1


if __name__ == "__main__":
    key = jax.random.PRNGKey(0)
    kx, kx2, kp = jax.random.split(key, 3)
    w1, b1, w2, b2 = init_params(kp)

    # 1) small batch, f32 end-to-end -> tight check vs the reference
    B = 8
    x = jax.random.normal(kx, (B, IN_DIM), jnp.float32)
    out = jax.block_until_ready(
        bp_net_forward(x, w1, b1, w2, b2, matmul_dtype=jnp.float32))
    ref = reference_forward(x, w1, b1, w2, b2)
    assert out.shape == (B, OUT_DIM)
    assert jnp.allclose(out, ref, atol=5e-4, rtol=5e-3), "f32 mismatch vs reference"
    assert jnp.allclose(jnp.sum(out, axis=1), 1.0, atol=1e-4), "rows must sum to ~1"

    # 2) awkward batch: granule padding + multi-step grid + ragged last block
    B2 = 77
    x2 = jax.random.normal(kx2, (B2, IN_DIM), jnp.float32)
    out2 = jax.block_until_ready(
        bp_net_forward(x2, w1, b1, w2, b2, matmul_dtype=jnp.float32, batch_tile=32))
    ref2 = reference_forward(x2, w1, b1, w2, b2)
    assert out2.shape == (B2, OUT_DIM)
    assert jnp.allclose(out2, ref2, atol=5e-4, rtol=5e-3), "ragged-grid mismatch"
    assert jnp.allclose(jnp.sum(out2, axis=1), 1.0, atol=1e-4)

    # 3) default path (bf16 matmul): halved x read traffic on v6e/v7x
    out3 = jax.block_until_ready(bp_net_forward(x, w1, b1, w2, b2))
    assert out3.shape == (B, OUT_DIM)
    assert jnp.allclose(out3, ref, atol=5e-3, rtol=5e-2), "bf16 mismatch vs reference"
    assert jnp.allclose(jnp.sum(out3, axis=1), 1.0, atol=2e-3)

    print("KERNEL_OK")
</pallas_src>

<mosaic_0001>
module attributes {stable_mosaic.version = 11 : i64} {
  func.func @bp_kernel(%arg0: i32, %arg1: memref<8x128xf32, #tpu.memory_space<vmem>>, %arg2: memref<128x64xf32, #tpu.memory_space<vmem>>, %arg3: memref<1x64xf32, #tpu.memory_space<vmem>>, %arg4: memref<64x128xf32, #tpu.memory_space<vmem>>, %arg5: memref<1x128xf32, #tpu.memory_space<vmem>>, %arg6: memref<8x128xf32, #tpu.memory_space<vmem>>) attributes {dimension_semantics = [#tpu.dimension_semantics<parallel>], iteration_bounds = array<i64: 1>, scalar_prefetch = 0 : i64, scratch_operands = 0 : i64, tpu.core_type = #tpu.core_type<tc>, window_params = [{transform_indices = @transform_0, window_bounds = array<i64: 8, 128>}, {pipeline_mode = #tpu.pipeline_mode<synchronous>, transform_indices = @transform_1, window_bounds = array<i64: 128, 64>}, {pipeline_mode = #tpu.pipeline_mode<synchronous>, transform_indices = @transform_2, window_bounds = array<i64: 1, 64>}, {pipeline_mode = #tpu.pipeline_mode<synchronous>, transform_indices = @transform_3, window_bounds = array<i64: 64, 128>}, {pipeline_mode = #tpu.pipeline_mode<synchronous>, transform_indices = @transform_4, window_bounds = array<i64: 1, 128>}, {transform_indices = @transform_5, window_bounds = array<i64: 8, 128>}]} {
    %c0 = arith.constant 0 : index
    %c0_0 = arith.constant 0 : index
    %0 = vector.load %arg1[%c0, %c0_0] : memref<8x128xf32, #tpu.memory_space<vmem>>, vector<8x128xf32>
    %c0_1 = arith.constant 0 : index
    %c0_2 = arith.constant 0 : index
    %1 = vector.load %arg2[%c0_1, %c0_2] : memref<128x64xf32, #tpu.memory_space<vmem>>, vector<128x64xf32>
    %cst = arith.constant dense<0.000000e+00> : vector<8x64xf32>
    %2 = tpu.matmul %0, %1, %cst {dimension_numbers = #tpu.dot_dimension_numbers<[1], [0], [0], [1], [0, 0, 1, 1], [], []>} : vector<8x128xf32>, vector<128x64xf32>, vector<8x64xf32> -> vector<8x64xf32>
    %c0_3 = arith.constant 0 : index
    %c0_4 = arith.constant 0 : index
    %3 = vector.load %arg3[%c0_3, %c0_4] : memref<1x64xf32, #tpu.memory_space<vmem>>, vector<1x64xf32>
    %4 = vector.broadcast %3 : vector<1x64xf32> to vector<8x64xf32>
    %5 = arith.addf %2, %4 : vector<8x64xf32>
    %cst_5 = arith.constant 0.000000e+00 : f32
    %6 = vector.broadcast %cst_5 : f32 to vector<8x64xf32>
    %7 = arith.maximumf %5, %6 : vector<8x64xf32>
    %c0_6 = arith.constant 0 : index
    %c0_7 = arith.constant 0 : index
    %8 = vector.load %arg4[%c0_6, %c0_7] : memref<64x128xf32, #tpu.memory_space<vmem>>, vector<64x128xf32>
    %cst_8 = arith.constant dense<0.000000e+00> : vector<8x128xf32>
    %9 = tpu.matmul %7, %8, %cst_8 {dimension_numbers = #tpu.dot_dimension_numbers<[1], [0], [0], [1], [0, 0, 1, 1], [], []>} : vector<8x64xf32>, vector<64x128xf32>, vector<8x128xf32> -> vector<8x128xf32>
    %c0_9 = arith.constant 0 : index
    %c0_10 = arith.constant 0 : index
    %10 = vector.load %arg5[%c0_9, %c0_10] : memref<1x128xf32, #tpu.memory_space<vmem>>, vector<1x128xf32>
    %11 = vector.broadcast %10 : vector<1x128xf32> to vector<8x128xf32>
    %12 = arith.addf %9, %11 : vector<8x128xf32>
    %cst_11 = arith.constant 0.000000e+00 : f32
    %13 = vector.broadcast %cst_11 : f32 to vector<8x128xf32>
    %14 = arith.maximumf %12, %13 : vector<8x128xf32>
    %15 = tpu.iota {dimensions = array<i32: 1>} : vector<8x128xi32>
    %c64_i32 = arith.constant 64 : i32
    %16 = vector.broadcast %c64_i32 : i32 to vector<8x128xi32>
    %17 = arith.cmpi slt, %15, %16 : vector<8x128xi32>
    %cst_12 = arith.constant 0.000000e+00 : f32
    %18 = vector.broadcast %cst_12 : f32 to vector<8x128xf32>
    %19 = arith.select %17, %14, %18 : vector<8x128xi1>, vector<8x128xf32>
    %cst_13 = arith.constant dense<0xFF800000> : vector<8xf32>
    %20 = vector.multi_reduction <maximumf>, %19, %cst_13 [1] : vector<8x128xf32> to vector<8xf32>
    %21 = vector.shape_cast %20 : vector<8xf32> to vector<8x1xf32>
    %cst_14 = arith.constant 0.000000e+00 : f32
    %22 = vector.broadcast %cst_14 : f32 to vector<8x128xf32>
    %23 = arith.select %17, %22, %14 : vector<8x128xi1>, vector<8x128xf32>
    %cst_15 = arith.constant dense<0xFF800000> : vector<8xf32>
    %24 = vector.multi_reduction <maximumf>, %23, %cst_15 [1] : vector<8x128xf32> to vector<8xf32>
    %25 = vector.shape_cast %24 : vector<8xf32> to vector<8x1xf32>
    %26 = vector.shape_cast %21 : vector<8x1xf32> to vector<8x1xf32>
    %27 = vector.broadcast %26 : vector<8x1xf32> to vector<8x128xf32>
    %28 = vector.shape_cast %25 : vector<8x1xf32> to vector<8x1xf32>
    %29 = vector.broadcast %28 : vector<8x1xf32> to vector<8x128xf32>
    %30 = arith.select %17, %27, %29 : vector<8x128xi1>, vector<8x128xf32>
    %31 = arith.subf %14, %30 : vector<8x128xf32>
    %32 = math.exp %31 : vector<8x128xf32>
    %cst_16 = arith.constant 0.000000e+00 : f32
    %33 = vector.broadcast %cst_16 : f32 to vector<8x128xf32>
    %34 = arith.select %17, %32, %33 : vector<8x128xi1>, vector<8x128xf32>
    %cst_17 = arith.constant dense<0.000000e+00> : vector<8xf32>
    %35 = vector.multi_reduction <add>, %34, %cst_17 [1] : vector<8x128xf32> to vector<8xf32>
    %36 = vector.shape_cast %35 : vector<8xf32> to vector<8x1xf32>
    %cst_18 = arith.constant 0.000000e+00 : f32
    %37 = vector.broadcast %cst_18 : f32 to vector<8x128xf32>
    %38 = arith.select %17, %37, %32 : vector<8x128xi1>, vector<8x128xf32>
    %cst_19 = arith.constant dense<0.000000e+00> : vector<8xf32>
    %39 = vector.multi_reduction <add>, %38, %cst_19 [1] : vector<8x128xf32> to vector<8xf32>
    %40 = vector.shape_cast %39 : vector<8xf32> to vector<8x1xf32>
    %41 = vector.shape_cast %36 : vector<8x1xf32> to vector<8x1xf32>
    %42 = vector.broadcast %41 : vector<8x1xf32> to vector<8x128xf32>
    %43 = vector.shape_cast %40 : vector<8x1xf32> to vector<8x1xf32>
    %44 = vector.broadcast %43 : vector<8x1xf32> to vector<8x128xf32>
    %45 = arith.select %17, %42, %44 : vector<8x128xi1>, vector<8x128xf32>
    %46 = tpu.reciprocal %45 {approx = true} : vector<8x128xf32> -> vector<8x128xf32>
    %47 = arith.mulf %45, %46 : vector<8x128xf32>
    %cst_20 = arith.constant 2.000000e+00 : f32
    %48 = vector.broadcast %cst_20 : f32 to vector<8x128xf32>
    %49 = arith.subf %48, %47 : vector<8x128xf32>
    %50 = arith.mulf %46, %49 : vector<8x128xf32>
    %51 = arith.mulf %32, %50 : vector<8x128xf32>
    %c0_21 = arith.constant 0 : index
    %c0_22 = arith.constant 0 : index
    %52 = vector.load %arg6[%c0_21, %c0_22] : memref<8x128xf32, #tpu.memory_space<vmem>>, vector<8x128xf32>
    tpu.vector_store %arg6[%c0_21, %c0_22], %51 {strides = array<i32>} : memref<8x128xf32, #tpu.memory_space<vmem>>, vector<8x128xf32>,
    return
  }
  func.func @transform_0(%arg0: i32) -> (i32, i32) {
    %c0_i32 = arith.constant 0 : i32
    %c0_i32_0 = arith.constant 0 : i32
    return %arg0, %c0_i32 : i32, i32
  }
  func.func @transform_1(%arg0: i32) -> (i32, i32) {
    %c0_i32 = arith.constant 0 : i32
    %c0_i32_0 = arith.constant 0 : i32
    %c0_i32_1 = arith.constant 0 : i32
    return %c0_i32, %c0_i32_0 : i32, i32
  }
  func.func @transform_2(%arg0: i32) -> (i32, i32) {
    %c0_i32 = arith.constant 0 : i32
    %c0_i32_0 = arith.constant 0 : i32
    %c0_i32_1 = arith.constant 0 : i32
    return %c0_i32, %c0_i32_0 : i32, i32
  }
  func.func @transform_3(%arg0: i32) -> (i32, i32) {
    %c0_i32 = arith.constant 0 : i32
    %c0_i32_0 = arith.constant 0 : i32
    %c0_i32_1 = arith.constant 0 : i32
    return %c0_i32, %c0_i32_0 : i32, i32
  }
  func.func @transform_4(%arg0: i32) -> (i32, i32) {
    %c0_i32 = arith.constant 0 : i32
    %c0_i32_0 = arith.constant 0 : i32
    %c0_i32_1 = arith.constant 0 : i32
    return %c0_i32, %c0_i32_0 : i32, i32
  }
  func.func @transform_5(%arg0: i32) -> (i32, i32) {
    %c0_i32 = arith.constant 0 : i32
    %c0_i32_0 = arith.constant 0 : i32
    return %arg0, %c0_i32 : i32, i32
  }
}

</mosaic_0001>

<bundles_post_ra>
// kernel: tpu_custom_call.1
= control target key start
LH: loop header
LB: loop body
LE: loop exit
PB: predicated region body
PF: predicated region fallthrough
CT: control target
= control target key end

     0   :  { %s297_s0 = inlined_call_operand.vmem [shape: f32[8,128], index: 0, kind: input, shape index: {}]   ;;  %s298_s1 = inlined_call_operand.vmem [shape: f32[128,64], index: 1, kind: input, shape index: {}]   ;;  %s299_s2 = inlined_call_operand.vmem [shape: f32[1,64], index: 2, kind: input, shape index: {}]   ;;  %s300_s3 = inlined_call_operand.vmem [shape: f32[64,128], index: 3, kind: input, shape index: {}]   ;;  %s301_s4 = inlined_call_operand.vmem [shape: f32[1,128], index: 4, kind: input, shape index: {}]   ;;  %s302_s5 = inlined_call_operand.hbm [shape: f32[8,128], index: 5, kind: output, shape index: {}]  }
   0x1   :  { %v37_v0 = vld [vmem:[%s298_s1 + $0x78] sm:$0xff]  ;;  %v36_v1 = vld [vmem:[%s298_s1 + $0x70] sm:$0xff]  ;;  %v35_v2 = vld [vmem:[%s298_s1 + $0x68] sm:$0xff] }
   0x2   :  { %42 = vmatpush.msra.mxu0 %v37_v0  ;;  %v34_v3 = vld [vmem:[%s298_s1 + $0x60] sm:$0xff]  ;;  %v70_v4 = vld [vmem:[%s300_s3 + $0x38] sm:$0xff]  ;;  %v69_v6 = vld [vmem:[%s300_s3 + $0x30] sm:$0xff] }
   0x3   :  { %v33_v5 = vld [vmem:[%s298_s1 + $0x58] sm:$0xff]  ;;  %87 = vmatpush.msra.mxu1 %v70_v4  ;;  %v68_v7 = vld [vmem:[%s300_s3 + $0x28] sm:$0xff]  ;;  %v32_v8 = vld [vmem:[%s298_s1 + $0x50] sm:$0xff] }
   0x4   :  { %43 = vmatpush.msra.mxu0 %v36_v1 }
   0x5   :  { %88 = vmatpush.msra.mxu1 %v69_v6 }
   0x6   :  { %44 = vmatpush.msra.mxu0 %v35_v2 }
   0x8   :  { %45 = vmatpush.msra.mxu0 %v34_v3 }
   0x9   :  { %10 = vsyncpa [#allocation3], 0  ;;  %v67_v9 = vld [vmem:[%s300_s3 + $0x20] sm:$0xff]  ;;  %v31_v10 = vld [vmem:[%s298_s1 + $0x48] sm:$0xff]  ;;  %89 = vmatpush.msra.mxu1 %v68_v7  ;;  %vm75_vm0 = vcmask 523264   ;;  %v100_v29 = vlaneseq  ;;  %s133_s21 = sshll.u32 %s302_s5, 4  ;;  %s134_s21 = int_to_ptr.hbm [resolvable:$true] %s133_s21 }
   0xa   :  { %46 = vmatpush.msra.mxu0 %v33_v5  ;;  %v66_v11 = vld [vmem:[%s300_s3 + $0x18] sm:$0xff]  ;;  %v30_v12 = vld [vmem:[%s298_s1 + $0x40] sm:$0xff]  ;;  %v28_v14 = vld [vmem:[%s298_s1 + $0x30] sm:$0xff] }
   0xb   :  { %90 = vmatpush.msra.mxu1 %v67_v9  ;;  %v29_v13 = vld [vmem:[%s298_s1 + $0x38] sm:$0xff]  ;;  %v27_v15 = vld [vmem:[%s298_s1 + $0x28] sm:$0xff]  ;;  %v26_v16 = vld [vmem:[%s298_s1 + $0x20] sm:$0xff]  ;;  %v101_v31 = vand.u32 127, %v100_v29 }
   0xc   :  { %47 = vmatpush.msra.mxu0 %v32_v8  ;;  %v25_v17 = vld [vmem:[%s298_s1 + $0x18] sm:$0xff]  ;;  %v24_v18 = vld [vmem:[%s298_s1 + $0x10] sm:$0xff]  ;;  %v23_v19 = vld [vmem:[%s298_s1 + $0x8] sm:$0xff] }
   0xd   :  { %91 = vmatpush.msra.mxu1 %v66_v11  ;;  %v22_v20 = vld [vmem:[%s298_s1] sm:$0xff]  ;;  %v65_v22 = vld [vmem:[%s300_s3 + $0x10] sm:$0xff]  ;;  %v64_v23 = vld [vmem:[%s300_s3 + $0x8] sm:$0xff]  ;;  %vm102_vm1 = vcmp.lt.s32.totalorder %v101_v31, 64 }
   0xe   :  { %48 = vmatpush.msra.mxu0 %v31_v10  ;;  %v21_v21 = vld [vmem:[%s297_s0] sm:$0xff] }
   0xf   :  { %92 = vmatpush.msra.mxu1 %v65_v22  ;;  %v63_v24 = vld [vmem:[%s300_s3] sm:$0xff] }
  0x10   :  { %49 = vmatpush.msra.mxu0 %v30_v12  ;;  %v144_v25 = vld [vmem:[%s299_s2] ss:$0 sm:$0xff]  ;;  %s176_s2 = smov [#allocation2]  }
  0x11   :  { %93 = vmatpush.msra.mxu1 %v64_v23  ;;  %v145_v30 = vld [vmem:[%s301_s4] ss:$0 sm:$0xff]  ;;  %s131_s3 = sshll.u32 %s176_s2, 4  ;;  %s132_s3 = int_to_ptr.vmem [resolvable:$true] %s131_s3 }
  0x12   :  { %50 = vmatpush.msra.mxu0 %v29_v13 }
  0x13   :  { %94 = vmatpush.msra.mxu1 %v63_v24 }
  0x14   :  { %51 = vmatpush.msra.mxu0 %v28_v14 }
  0x16   :  { %52 = vmatpush.msra.mxu0 %v27_v15 }
  0x18   :  { %53 = vmatpush.msra.mxu0 %v26_v16 }
  0x1a   :  { %54 = vmatpush.msra.mxu0 %v25_v17 }
  0x1c   :  { %55 = vmatpush.msra.mxu0 %v24_v18 }
  0x1e   :  { %56 = vmatpush.msra.mxu0 %v23_v19 }
  0x20   :  { %57 = vmatpush.msra.mxu0 %v22_v20 }
  0x21   :  { %58 = vmatmul.f32.vlgmr.msra.gmra.mxu0 %v21_v21 }
  0x9e   :  { %v59_v26 = vpop.f32.mrf.mxu0 }
  0x9f   :  { %v60_v27 = vadd.f32 %v144_v25, %v59_v26 }
  0xa1   :  { %v62_v28 = vmax.f32 %v60_v27, 0.0 }
  0xa3   :  { %142 = vmatmul.msk.f32.vlgmr.msra.gmra.mxu1 %vm75_vm0, %v62_v28 }
 0x120   :  { %v96_v32 = vpop.f32.mrf.mxu1 }
 0x121   :  { %v97_v33 = vadd.f32 %v145_v30, %v96_v32 }
 0x123   :  { %v99_v34 = vmax.f32 %v97_v33, 0.0 }
 0x125   :  { %v103_v35 = vsel %vm102_vm1, %v99_v34, 0.0  ;;  %v106_v36 = vsel %vm102_vm1, 0.0, %v99_v34 }
 0x126   :  { %104 = vmax.xlane.f32.xlu0 %v103_v35 }
 0x12e   :  { %107 = vmax.xlane.f32.xlu0 %v106_v36 }
 0x199   :  { %v105_v37 = vpop.xlane.xlu0 %104 }
 0x1a1   :  { %v108_v38 = vpop.xlane.xlu0 %107 }
 0x1a2   :  { %v109_v39 = vsel %vm102_vm1, %v105_v37, %v108_v38 }
 0x1a3   :  { %v110_v40 = vsub.f32 %v99_v34, %v109_v39 }
 0x1a5   :  { %v111_v41 = vmul.f32 1.442695, %v110_v40 }
 0x1a7   :  { %146 = vpow2.f32 %v111_v41 }
 0x1ad   :  { %v147_v42 = vpop.eup %146 }
 0x1ae   :  { %v113_v43 = vsel %vm102_vm1, %v147_v42, 0.0  ;;  %v116_v44 = vsel %vm102_vm1, 0.0, %v147_v42 }
 0x1af   :  { %114 = vadd.xlane.f32.xlu1 %v113_v43 }
 0x1b7   :  { %117 = vadd.xlane.f32.xlu1 %v116_v44 }
 0x222   :  { %v115_v45 = vpop.xlane.xlu1 %114 }
 0x22a   :  { %v118_v46 = vpop.xlane.xlu1 %117 }
 0x22b   :  { %v119_v47 = vsel %vm102_vm1, %v115_v45, %v118_v46 }
 0x22c   :  { %148 = vrcp.f32 %v119_v47 }
 0x232   :  { %v149_v48 = vpop.eup %148 }
 0x233   :  { %v121_v49 = vmul.f32 %v149_v48, %v119_v47 }
 0x235   :  { %v122_v50 = vsub.f32 2.0, %v121_v49 }
 0x237   :  { %v123_v51 = vmul.f32 %v149_v48, %v122_v50 }
 0x239   :  { %v124_v52 = vmul.f32 %v147_v42, %v123_v51 }
 0x23b   :  { %125 = vst [vmem:[#allocation2] sm:$0xff] %v124_v52 }
 0x23c   :  { %136 = dma.vmem_to_hbm [thread:$0]  %s132_s3, 128, %s134_s21, [#allocation3]  }
 0x23d   :  { %174 = dma.done.wait [#allocation3], 128  }
 0x23e   :  { %175 = vsyncadd [#allocation3], 4294967168 }
 0x23f   :  { %141 = vsyncpa [#allocation3], 1 }

</bundles_post_ra>
